<compile_context>
chip_gen: v7x
topology: tpu7x:2x2x1
jax: 0.10.0
libtpu: 0.0.40
codegen_flags: <defaults>
</compile_context>

<pallas_src>
import functools

import jax
import jax.numpy as jnp
from jax.experimental import pallas as pl
from jax.experimental.pallas import tpu as pltpu


# TODO(synk): Application.forward is abstract in the reference module (raises
# NotImplementedError); identity pass-through is the only well-defined
# base-class semantics and is what this kernel implements.
# TODO(synk): Application.compute_loss is abstract and has no kernel equivalent.
def _copy_kernel(x_ref, o_ref):
    # Elementwise pass-through on the current VMEM tile.
    o_ref[...] = x_ref[...]


_LANE_CANDIDATES = (4096, 2048, 1024, 512, 256, 128)
_DEFAULT_BLOCK_BYTES = 2 * 1024 * 1024
# 4x (in + out, double-buffered) of a 12 MiB block = 48 MiB footprint: inside
# the ~56 MiB usable ceiling of v7x's 64 MiB physical VMEM and well inside
# v5e/v6e's 128 MiB.
_MAX_BLOCK_BYTES = 12 * 1024 * 1024


def _compiler_params(block_bytes: int) -> pltpu.CompilerParams:
    # Footprint = input + output, each double-buffered.
    footprint = 4 * block_bytes
    kwargs = dict(dimension_semantics=("parallel",))
    if footprint > 12 * 1024 * 1024:
        # Only raise the scoped-VMEM limit when blocks are scaled beyond the
        # default budgets (v5e default is 16 MiB); cap below v7x physical VMEM.
        kwargs["vmem_limit_bytes"] = min(footprint + (4 << 20), 56 * 1024 * 1024)
    return pltpu.CompilerParams(**kwargs)


@functools.partial(
    jax.jit, static_argnames=("target_block_bytes", "alias_input")
)
def _materialized_copy(
    x: jax.Array,
    *,
    target_block_bytes: int = _DEFAULT_BLOCK_BYTES,
    alias_input: bool = False,
) -> jax.Array:
    """Memory-bound Pallas copy (kept as the compute template for subclasses)."""
    orig_shape = x.shape
    dtype = x.dtype
    n = x.size
    if n == 0:
        return x

    itemsize = jnp.dtype(dtype).itemsize
    tbb = max(4096, min(int(target_block_bytes), _MAX_BLOCK_BYTES))
    # dtype-aware sublane multiple: f32 -> 8, bf16/f16 -> 16, int8/fp8 -> 32.
    sub_mult = max(8, 32 // itemsize)
    cost = pl.CostEstimate(
        flops=0, transcendentals=0, bytes_accessed=2 * n * itemsize
    )
    alias = {0: 0} if alias_input else {}

    x_flat = x.reshape(-1)

    if n % 128 == 0:
        # Lane-dense 2-D path: pick the widest last dim (multiple of 128) that
        # divides the element count -> unmasked full-lane stores.
        lanes = next(c for c in _LANE_CANDIDATES if n % c == 0)
        rows = n // lanes
        # Multi-MiB row tiles amortize the ~0.35 us per-grid-step overhead.
        desired = max(sub_mult, tbb // (lanes * itemsize))
        desired = (desired // sub_mult) * sub_mult
        tile_rows = rows if desired >= rows else desired
        block_bytes = tile_rows * lanes * itemsize

        out2d = pl.pallas_call(
            _copy_kernel,
            out_shape=jax.ShapeDtypeStruct((rows, lanes), dtype),
            grid_spec=pltpu.PrefetchScalarGridSpec(
                num_scalar_prefetch=0,
                grid=(pl.cdiv(rows, tile_rows),),
                in_specs=[pl.BlockSpec((tile_rows, lanes), lambda i: (i, 0))],
                out_specs=pl.BlockSpec((tile_rows, lanes), lambda i: (i, 0)),
            ),
            compiler_params=_compiler_params(block_bytes),
            cost_estimate=cost,
            input_output_aliases=alias,
        )(x_flat.reshape(rows, lanes))
        return out2d.reshape(orig_shape)

    # Ragged path (element count not a multiple of 128): no jnp.pad and no
    # output slice.  Tile the flat data (viewed as (1, n), a zero-cost reshape)
    # with multiple-of-128 blocks; Pallas masks the partial last block's
    # stores, so the path stays at exactly 1 HBM read + 1 HBM write.
    blk = min(tbb // itemsize, 65536)  # cap: sublane padding of a (1, blk) tile
    blk = max(1024, (blk // 1024) * 1024)
    if blk >= n:
        blk = n  # single block equal to the full dim (always legal)
    block_bytes = 8 * blk * itemsize  # account for sublane padding of (1, blk)

    out2d = pl.pallas_call(
        _copy_kernel,
        out_shape=jax.ShapeDtypeStruct((1, n), dtype),
        grid_spec=pltpu.PrefetchScalarGridSpec(
            num_scalar_prefetch=0,
            grid=(pl.cdiv(n, blk),),
            in_specs=[pl.BlockSpec((1, blk), lambda i: (0, i))],
            out_specs=pl.BlockSpec((1, blk), lambda i: (0, i)),
        ),
        compiler_params=_compiler_params(block_bytes),
        cost_estimate=cost,
        input_output_aliases=alias,
    )(x_flat.reshape(1, n))
    return out2d.reshape(orig_shape)


def application_forward(
    x: jax.Array,
    *,
    materialize: bool = False,
    target_block_bytes: int = _DEFAULT_BLOCK_BYTES,
    alias_input: bool = False,
) -> jax.Array:
    """Identity forward pass (base-class semantics).

    Default is a true short-circuit (returns `x`: zero HBM traffic, no launch).
    `materialize=True` runs the memory-bound Pallas copy kernel instead, which
    exists as the tiling/pipelining template for concrete Application
    subclasses that perform real compute.
    """
    if not materialize:
        return x
    return _materialized_copy(
        x, target_block_bytes=target_block_bytes, alias_input=alias_input
    )


if __name__ == "__main__":
    key = jax.random.PRNGKey(0)

    # 1) Aligned NCHW f32 input -> lane-dense 2-D copy path.
    x = jax.random.normal(key, (2, 4, 16, 16), dtype=jnp.float32)
    y = application_forward(x, materialize=True)
    jax.block_until_ready(y)
    assert y.shape == x.shape and y.dtype == x.dtype
    assert bool(jnp.array_equal(y, x)), "identity forward mismatch (aligned)"

    # 2) Default identity short-circuit: no kernel, no HBM traffic.
    y_id = application_forward(x)
    assert y_id is x

    # 3) Ragged element count (210): single full block, no pad / no slice.
    x2 = jax.random.normal(key, (2, 3, 5, 7), dtype=jnp.float32)
    y2 = application_forward(x2, materialize=True)
    jax.block_until_ready(y2)
    assert y2.shape == x2.shape and y2.dtype == x2.dtype
    assert bool(jnp.array_equal(y2, x2)), "identity forward mismatch (ragged)"

    # 4) Ragged multi-block path: masked partial last block (2730 elems,
    #    1024-element blocks -> grid of 3 with a 682-element tail).
    x3 = jax.random.normal(key, (3, 7, 130), dtype=jnp.float32)
    y3 = application_forward(x3, materialize=True, target_block_bytes=4096)
    jax.block_until_ready(y3)
    assert y3.shape == x3.shape and y3.dtype == x3.dtype
    assert bool(jnp.array_equal(y3, x3)), "identity forward mismatch (masked tail)"

    # 5) bf16 aligned path (packed sublane multiple = 16).
    x4 = jax.random.normal(key, (2, 8, 8, 8), dtype=jnp.bfloat16)
    y4 = application_forward(x4, materialize=True)
    jax.block_until_ready(y4)
    assert y4.shape == x4.shape and y4.dtype == x4.dtype
    assert bool(jnp.array_equal(y4, x4)), "identity forward mismatch (bf16)"

    print("KERNEL_OK")
</pallas_src>

<mosaic_0001>
module attributes {stable_mosaic.version = 11 : i64} {
  func.func @_copy_kernel(%arg0: i32, %arg1: memref<1x2048xf32, #tpu.memory_space<vmem>>, %arg2: memref<1x2048xf32, #tpu.memory_space<vmem>>) attributes {dimension_semantics = [#tpu.dimension_semantics<parallel>], iteration_bounds = array<i64: 1>, scalar_prefetch = 0 : i64, scratch_operands = 0 : i64, tpu.core_type = #tpu.core_type<tc>, window_params = [{transform_indices = @transform_0, window_bounds = array<i64: 1, 2048>}, {transform_indices = @transform_1, window_bounds = array<i64: 1, 2048>}]} {
    %c0 = arith.constant 0 : index
    %c0_0 = arith.constant 0 : index
    %0 = vector.load %arg1[%c0, %c0_0] : memref<1x2048xf32, #tpu.memory_space<vmem>>, vector<1x2048xf32>
    %c0_1 = arith.constant 0 : index
    %c0_2 = arith.constant 0 : index
    %1 = vector.load %arg2[%c0_1, %c0_2] : memref<1x2048xf32, #tpu.memory_space<vmem>>, vector<1x2048xf32>
    tpu.vector_store %arg2[%c0_1, %c0_2], %0 {strides = array<i32>} : memref<1x2048xf32, #tpu.memory_space<vmem>>, vector<1x2048xf32>,
    return
  }
  func.func @transform_0(%arg0: i32) -> (i32, i32) {
    %c0_i32 = arith.constant 0 : i32
    %c0_i32_0 = arith.constant 0 : i32
    return %arg0, %c0_i32 : i32, i32
  }
  func.func @transform_1(%arg0: i32) -> (i32, i32) {
    %c0_i32 = arith.constant 0 : i32
    %c0_i32_0 = arith.constant 0 : i32
    return %arg0, %c0_i32 : i32, i32
  }
}

</mosaic_0001>

<bundles_post_ra>
// kernel: _materialized_copy.1
= control target key start
LH: loop header
LB: loop body
LE: loop exit
PB: predicated region body
PF: predicated region fallthrough
CT: control target
= control target key end

     0   :  { %s38_s0 = inlined_call_operand.vmem [shape: f32[1,2048], index: 0, kind: input, shape index: {}]   ;;  %s39_s1 = inlined_call_operand.vmem [shape: f32[1,2048], index: 1, kind: output, shape index: {}]  }
   0x1   :  { %v8_v0 = vld [vmem:[%s38_s0] sm:$0xff]  ;;  %v9_v1 = vld [vmem:[%s38_s0 + $0x8] sm:$0xff] }
   0x2   :  { %10 = vst [vmem:[%s39_s1] sm:$0xff] %v8_v0  ;;  %11 = vst [vmem:[%s39_s1 + $0x8] sm:$0xff] %v9_v1 }

</bundles_post_ra>
